<compile_context>
chip_gen: v5e
topology: v5e:2x2
jax: 0.10.0
libtpu: 0.0.40
codegen_flags: <defaults>
</compile_context>

<pallas_src>
import functools

import jax
import jax.numpy as jnp
from jax.experimental import pallas as pl
from jax.experimental.pallas import tpu as pltpu


def _round_up(a: int, b: int) -> int:
    return ((a + b - 1) // b) * b


def _vmem_capacity_bytes() -> int:
    try:
        return int(pltpu.get_tpu_info().vmem_capacity_bytes)
    except Exception:
        # Conservative fallback (v7x per-TensorCore size); safe on all chips.
        return 64 * 1024 * 1024


def _select_tiles(M, Hp, F, w_itemsize, out_itemsize, vmem_budget):
    """Pick (tm, tf) so the double-buffered working set fits the VMEM budget."""
    Mp128 = _round_up(max(M, 1), 128)
    Fp128 = _round_up(F, 128)
    candidates = [(512, 1024), (512, 512), (256, 1024), (256, 512),
                  (256, 256), (128, 512), (128, 256), (128, 128)]
    best = None
    for tm, tf in candidates:
        tm = min(tm, Mp128)
        tf = min(tf, Fp128)
        # Keep >= 2 row tiles when possible so v7x megacore can shard the
        # "parallel" row axis across its 2 TensorCores.
        if Mp128 >= 256:
            tm = min(tm, _round_up(-(-Mp128 // 2), 128))
        ws = (2 * tm * Hp * w_itemsize            # x row tile (double-buffered)
              + 2 * Hp * (2 * tf) * w_itemsize    # fused Wg|W1 tile
              + 2 * tf * Hp * w_itemsize          # W2 tile
              + 2 * tm * Hp * out_itemsize        # output tile
              + tm * Hp * 4)                      # f32 accumulator
        if ws <= vmem_budget:
            return tm, tf, ws
        if best is None or ws < best[2]:
            best = (tm, tf, ws)
    return best


def prepare_swiglu_weights(wg, w1, w2, tf, compute_dtype):
    """Cast, pad and pre-tile the weights for contiguous per-step DMA bursts.

    Returns:
      wgu  : (nf, Hp, 2*tf)  fused gate|up tiles (one contiguous block per f)
      w2_t : (nf, tf, Hp)    down-proj tiles (one contiguous block per f)
    # TODO(synk): hoist this to model init (weights are static per call).
    """
    H, F = wg.shape
    Hp = _round_up(H, 128)
    Fp = _round_up(F, tf)
    nf = Fp // tf

    wg_p = jnp.pad(wg.astype(compute_dtype), ((0, Hp - H), (0, Fp - F)))
    w1_p = jnp.pad(w1.astype(compute_dtype), ((0, Hp - H), (0, Fp - F)))
    wg_t = wg_p.reshape(Hp, nf, tf).transpose(1, 0, 2)
    w1_t = w1_p.reshape(Hp, nf, tf).transpose(1, 0, 2)
    wgu = jnp.concatenate([wg_t, w1_t], axis=-1)          # (nf, Hp, 2*tf)

    w2_p = jnp.pad(w2.astype(compute_dtype), ((0, Fp - F), (0, Hp - H)))
    w2_t = w2_p.reshape(nf, tf, Hp)                        # (nf, tf, Hp)
    return wgu, w2_t


def swiglu_kernel(x_ref, wgu_ref, w2_ref, o_ref, acc_ref, *, tf):
    """One (row-tile, F-tile) step of SwiGLU.

    x_ref   : (tm, Hp)      row tile (resident across the F axis)
    wgu_ref : (Hp, 2*tf)    fused gate|up weight tile
    w2_ref  : (tf, Hp)      down-proj weight tile
    o_ref   : (tm, Hp)      output row tile
    acc_ref : (tm, Hp)      f32 accumulator scratch
    """
    f = pl.program_id(1)

    x = x_ref[...]
    gl = jnp.dot(x, wgu_ref[...], preferred_element_type=jnp.float32)  # (tm, 2*tf)
    g = gl[:, :tf]
    lin = gl[:, tf:]
    h = (g * jax.nn.sigmoid(g)) * lin                                  # f32 SiLU + gate
    part = jnp.dot(h.astype(w2_ref.dtype), w2_ref[...],
                   preferred_element_type=jnp.float32)                 # (tm, Hp)

    @pl.when(f == 0)
    def _():
        acc_ref[...] = part        # assign (no zero-fill pass)

    @pl.when(f != 0)
    def _():
        acc_ref[...] += part

    @pl.when(f == pl.num_programs(1) - 1)
    def _():
        o_ref[...] = acc_ref[...].astype(o_ref.dtype)


def swiglu_pallas(x, wg, w1, w2, *, compute_dtype=jnp.bfloat16):
    """x: (..., H); wg, w1: (H, F); w2: (F, H). Returns (..., H) in x.dtype."""
    *lead, H = x.shape
    F = wg.shape[1]
    M = 1
    for d in lead:
        M *= d
    out_dtype = x.dtype
    w_itemsize = jnp.dtype(compute_dtype).itemsize
    out_itemsize = jnp.dtype(out_dtype).itemsize

    Hp = _round_up(H, 128)

    # Per-generation VMEM budget with headroom for compiler internal scratch.
    vmem_cap = _vmem_capacity_bytes()
    vmem_budget = max(vmem_cap - 12 * 1024 * 1024, (vmem_cap * 3) // 4)

    tm, tf, ws = _select_tiles(M, Hp, F, w_itemsize, out_itemsize, vmem_budget)

    Mp = _round_up(max(M, 1), tm)
    Fp = _round_up(F, tf)
    nf = Fp // tf
    grid = (Mp // tm, nf)

    x2d = x.reshape(M, H)
    if x2d.dtype != compute_dtype:
        x2d = x2d.astype(compute_dtype)
    if (Mp, Hp) != (M, H):
        x2d = jnp.pad(x2d, ((0, Mp - M), (0, Hp - H)))

    wgu, w2_t = prepare_swiglu_weights(wg, w1, w2, tf, compute_dtype)

    # Never request VMEM equal to physical; leave headroom (important on v7x).
    vmem_limit = int(min(vmem_cap - 8 * 1024 * 1024,
                         max(ws + 4 * 1024 * 1024, 32 * 1024 * 1024)))

    cost = pl.CostEstimate(
        flops=6 * Mp * Hp * Fp,                       # three matmuls, 2*M*H*F each
        transcendentals=Mp * Fp,                      # sigmoid
        bytes_accessed=int(
            w_itemsize * (Mp * Hp                     # x
                          + grid[0] * 3 * Hp * Fp)    # streamed weights per row tile
            + out_itemsize * Mp * Hp),                # output
    )

    kernel = functools.partial(swiglu_kernel, tf=tf)

    out2d = pl.pallas_call(
        kernel,
        out_shape=jax.ShapeDtypeStruct((Mp, Hp), out_dtype),
        grid_spec=pltpu.PrefetchScalarGridSpec(
            num_scalar_prefetch=0,
            grid=grid,
            in_specs=[
                pl.BlockSpec((tm, Hp), lambda i, f: (i, 0)),           # x row tile
                pl.BlockSpec((None, Hp, 2 * tf), lambda i, f: (f, 0, 0)),  # Wg|W1
                pl.BlockSpec((None, tf, Hp), lambda i, f: (f, 0, 0)),      # W2
            ],
            out_specs=pl.BlockSpec((tm, Hp), lambda i, f: (i, 0)),
            scratch_shapes=[pltpu.VMEM((tm, Hp), jnp.float32)],
        ),
        compiler_params=pltpu.CompilerParams(
            dimension_semantics=("parallel", "arbitrary"),
            vmem_limit_bytes=vmem_limit,
        ),
        cost_estimate=cost,
    )(x2d, wgu, w2_t)

    return out2d[:M, :H].reshape(*lead, H)


def swiglu_ref(x, wg, w1, w2):
    g = x @ wg
    gate = g * jax.nn.sigmoid(g)
    lin = x @ w1
    return (gate * lin) @ w2


if __name__ == "__main__":
    # Small, deterministic shapes: hidden_dim=48 -> inner dim = 48*8//3 = 128.
    B, S, H = 2, 8, 48
    Fdim = H * 8 // 3  # 128

    key = jax.random.PRNGKey(0)
    kx, kg, k1, k2 = jax.random.split(key, 4)

    x = jax.random.normal(kx, (B, S, H), dtype=jnp.float32)
    # torch.nn.Linear weights are (out, in); store them transposed as (in, out).
    wg = jax.random.normal(kg, (H, Fdim), dtype=jnp.float32) * 0.05
    w1 = jax.random.normal(k1, (H, Fdim), dtype=jnp.float32) * 0.05
    w2 = jax.random.normal(k2, (Fdim, H), dtype=jnp.float32) * 0.05

    ref = swiglu_ref(x, wg, w1, w2)

    # Default path: bf16 MXU matmuls with f32 accumulation (looser tolerance).
    out_bf16 = jax.block_until_ready(swiglu_pallas(x, wg, w1, w2))
    assert out_bf16.shape == (B, S, H)
    assert jnp.allclose(out_bf16, ref, atol=3e-2, rtol=3e-2), "bf16 mismatch vs reference"

    # Explicit f32 compute path (tight tolerance).
    out_f32 = jax.block_until_ready(
        swiglu_pallas(x, wg, w1, w2, compute_dtype=jnp.float32))
    assert out_f32.shape == (B, S, H)
    assert jnp.allclose(out_f32, ref, atol=2e-4, rtol=2e-4), "f32 mismatch vs reference"

    # Lane-aligned hidden dim (H=128) exercises the no-pad fast path for x.
    H2, F2 = 128, 128 * 8 // 3 // 128 * 128 + 128  # 128, 384 (tileable)
    kx2, kg2, k12, k22 = jax.random.split(jax.random.PRNGKey(1), 4)
    x2 = jax.random.normal(kx2, (2, 8, H2), dtype=jnp.float32)
    wg2 = jax.random.normal(kg2, (H2, F2), dtype=jnp.float32) * 0.05
    w12 = jax.random.normal(k12, (H2, F2), dtype=jnp.float32) * 0.05
    w22 = jax.random.normal(k22, (F2, H2), dtype=jnp.float32) * 0.05
    ref2 = swiglu_ref(x2, wg2, w12, w22)
    out2 = jax.block_until_ready(swiglu_pallas(x2, wg2, w12, w22))
    assert jnp.allclose(out2, ref2, atol=5e-2, rtol=5e-2), "aligned-H mismatch vs reference"

    print("KERNEL_OK")
</pallas_src>

<mosaic_0001>
module attributes {stable_mosaic.version = 11 : i64} {
  func.func @swiglu_kernel(%arg0: i32, %arg1: i32, %arg2: memref<128x128xbf16, #tpu.memory_space<vmem>>, %arg3: memref<1x128x256xbf16, #tpu.memory_space<vmem>>, %arg4: memref<1x128x128xbf16, #tpu.memory_space<vmem>>, %arg5: memref<128x128xf32, #tpu.memory_space<vmem>>, %arg6: memref<128x128xf32, #tpu.memory_space<vmem>>) attributes {dimension_semantics = [#tpu.dimension_semantics<parallel>, #tpu.dimension_semantics<arbitrary>], iteration_bounds = array<i64: 1, 1>, scalar_prefetch = 0 : i64, scratch_operands = 1 : i64, tpu.core_type = #tpu.core_type<tc>, window_params = [{transform_indices = @transform_0, window_bounds = array<i64: 128, 128>}, {transform_indices = @transform_1, window_bounds = array<i64: 1, 128, 256>}, {transform_indices = @transform_2, window_bounds = array<i64: 1, 128, 128>}, {transform_indices = @transform_3, window_bounds = array<i64: 128, 128>}]} {
    %c0 = arith.constant 0 : index
    %c0_0 = arith.constant 0 : index
    %0 = vector.load %arg2[%c0, %c0_0] : memref<128x128xbf16, #tpu.memory_space<vmem>>, vector<128x128xbf16>
    %c0_1 = arith.constant 0 : index
    %c0_2 = arith.constant 0 : index
    %c0_3 = arith.constant 0 : index
    %1 = vector.load %arg3[%c0_1, %c0_2, %c0_3] : memref<1x128x256xbf16, #tpu.memory_space<vmem>>, vector<1x128x256xbf16>
    %2 = vector.shape_cast %1 : vector<1x128x256xbf16> to vector<128x256xbf16>
    %cst = arith.constant dense<0.000000e+00> : vector<128x256xf32>
    %3 = tpu.matmul %0, %2, %cst {dimension_numbers = #tpu.dot_dimension_numbers<[1], [0], [0], [1], [0, 0, 1, 1], [], []>} : vector<128x128xbf16>, vector<128x256xbf16>, vector<128x256xf32> -> vector<128x256xf32>
    %4 = vector.extract_strided_slice %3 {offsets = [0, 0], sizes = [128, 128], strides = [1, 1]} : vector<128x256xf32> to vector<128x128xf32>
    %5 = vector.extract_strided_slice %3 {offsets = [0, 128], sizes = [128, 128], strides = [1, 1]} : vector<128x256xf32> to vector<128x128xf32>
    %6 = arith.negf %4 : vector<128x128xf32>
    %7 = math.exp %6 : vector<128x128xf32>
    %cst_4 = arith.constant 1.000000e+00 : f32
    %8 = vector.broadcast %cst_4 : f32 to vector<128x128xf32>
    %9 = arith.addf %8, %7 : vector<128x128xf32>
    %10 = arith.divf %8, %9 : vector<128x128xf32>
    %11 = arith.mulf %4, %10 : vector<128x128xf32>
    %12 = arith.mulf %11, %5 : vector<128x128xf32>
    %13 = arith.truncf %12 : vector<128x128xf32> to vector<128x128xbf16>
    %c0_5 = arith.constant 0 : index
    %c0_6 = arith.constant 0 : index
    %c0_7 = arith.constant 0 : index
    %14 = vector.load %arg4[%c0_5, %c0_6, %c0_7] : memref<1x128x128xbf16, #tpu.memory_space<vmem>>, vector<1x128x128xbf16>
    %15 = vector.shape_cast %14 : vector<1x128x128xbf16> to vector<128x128xbf16>
    %cst_8 = arith.constant dense<0.000000e+00> : vector<128x128xf32>
    %16 = tpu.matmul %13, %15, %cst_8 {dimension_numbers = #tpu.dot_dimension_numbers<[1], [0], [0], [1], [0, 0, 1, 1], [], []>} : vector<128x128xbf16>, vector<128x128xbf16>, vector<128x128xf32> -> vector<128x128xf32>
    %c0_i32 = arith.constant 0 : i32
    %17 = arith.cmpi eq, %arg1, %c0_i32 : i32
    %18 = arith.extui %17 : i1 to i32
    %c0_i32_9 = arith.constant 0 : i32
    %19 = arith.cmpi ne, %18, %c0_i32_9 : i32
    scf.if %19 {
      %c0_14 = arith.constant 0 : index
      %c0_15 = arith.constant 0 : index
      %26 = vector.load %arg6[%c0_14, %c0_15] : memref<128x128xf32, #tpu.memory_space<vmem>>, vector<128x128xf32>
      tpu.vector_store %arg6[%c0_14, %c0_15], %16 {strides = array<i32>} : memref<128x128xf32, #tpu.memory_space<vmem>>, vector<128x128xf32>,
    } else {
    }
    %c0_i32_10 = arith.constant 0 : i32
    %20 = arith.cmpi ne, %arg1, %c0_i32_10 : i32
    %21 = arith.extui %20 : i1 to i32
    %c0_i32_11 = arith.constant 0 : i32
    %22 = arith.cmpi ne, %21, %c0_i32_11 : i32
    scf.if %22 {
      %c0_14 = arith.constant 0 : index
      %c0_15 = arith.constant 0 : index
      %26 = vector.load %arg6[%c0_14, %c0_15] : memref<128x128xf32, #tpu.memory_space<vmem>>, vector<128x128xf32>
      %27 = arith.addf %26, %16 : vector<128x128xf32>
      %c0_16 = arith.constant 0 : index
      %c0_17 = arith.constant 0 : index
      %28 = vector.load %arg6[%c0_16, %c0_17] : memref<128x128xf32, #tpu.memory_space<vmem>>, vector<128x128xf32>
      tpu.vector_store %arg6[%c0_16, %c0_17], %27 {strides = array<i32>} : memref<128x128xf32, #tpu.memory_space<vmem>>, vector<128x128xf32>,
    } else {
    }
    %c0_i32_12 = arith.constant 0 : i32
    %23 = arith.cmpi eq, %arg1, %c0_i32_12 : i32
    %24 = arith.extui %23 : i1 to i32
    %c0_i32_13 = arith.constant 0 : i32
    %25 = arith.cmpi ne, %24, %c0_i32_13 : i32
    scf.if %25 {
      %c0_14 = arith.constant 0 : index
      %c0_15 = arith.constant 0 : index
      %26 = vector.load %arg6[%c0_14, %c0_15] : memref<128x128xf32, #tpu.memory_space<vmem>>, vector<128x128xf32>
      %c0_16 = arith.constant 0 : index
      %c0_17 = arith.constant 0 : index
      %27 = vector.load %arg5[%c0_16, %c0_17] : memref<128x128xf32, #tpu.memory_space<vmem>>, vector<128x128xf32>
      tpu.vector_store %arg5[%c0_16, %c0_17], %26 {strides = array<i32>} : memref<128x128xf32, #tpu.memory_space<vmem>>, vector<128x128xf32>,
    } else {
    }
    return
  }
  func.func @transform_0(%arg0: i32, %arg1: i32) -> (i32, i32) {
    %c0_i32 = arith.constant 0 : i32
    %c0_i32_0 = arith.constant 0 : i32
    return %arg0, %c0_i32 : i32, i32
  }
  func.func @transform_1(%arg0: i32, %arg1: i32) -> (i32, i32, i32) {
    %c0_i32 = arith.constant 0 : i32
    %c0_i32_0 = arith.constant 0 : i32
    %c0_i32_1 = arith.constant 0 : i32
    return %arg1, %c0_i32, %c0_i32_0 : i32, i32, i32
  }
  func.func @transform_2(%arg0: i32, %arg1: i32) -> (i32, i32, i32) {
    %c0_i32 = arith.constant 0 : i32
    %c0_i32_0 = arith.constant 0 : i32
    %c0_i32_1 = arith.constant 0 : i32
    return %arg1, %c0_i32, %c0_i32_0 : i32, i32, i32
  }
  func.func @transform_3(%arg0: i32, %arg1: i32) -> (i32, i32) {
    %c0_i32 = arith.constant 0 : i32
    %c0_i32_0 = arith.constant 0 : i32
    return %arg0, %c0_i32 : i32, i32
  }
}

</mosaic_0001>

<bundles_post_ra>
// kernel: tpu_custom_call.1
= control target key start
LH: loop header
LB: loop body
LE: loop exit
PB: predicated region body
PF: predicated region fallthrough
CT: control target
= control target key end

     0   :  { %8 = vsyncpa [#allocation4], 0  ;;  %s1644_s0 = inlined_call_operand.hbm [shape: bf16[128,128], index: 0, kind: input, shape index: {}]   ;;  %s1645_s1 = inlined_call_operand.hbm [shape: bf16[1,128,256], index: 1, kind: input, shape index: {}]   ;;  %s1646_s2 = inlined_call_operand.hbm [shape: bf16[1,128,128], index: 2, kind: input, shape index: {}]   ;;  %s1647_s3 = inlined_call_operand.hbm [shape: f32[128,128], index: 3, kind: output, shape index: {}]  }
   0x1   :  { %9 = vsyncpa [#allocation7], 0  ;;  %s28_s14 = sshll.u32 %s1645_s1, 4  ;;  %s29_s14 = int_to_ptr.hbm [resolvable:$true] %s28_s14 }
   0x2   :  { %10 = vsyncpa [#allocation5], 0  ;;  %s1278_s15 = smov [#allocation6]   ;;  %s15_s19 = sshll.u32 %s1644_s0, 4  ;;  %s16_s19 = int_to_ptr.hbm [resolvable:$true] %s15_s19 }
   0x3   :  { %s30_s16 = sshll.u32 %s1278_s15, 4  ;;  %s1279_s20 = smov 128   ;;  %s31_s16 = int_to_ptr.vmem [resolvable:$true] %s30_s16 }
   0x4   :  { %s1280_s21 = smov 8   ;;  %s1281_s22 = smov [#allocation3]  }
   0x5   :  { %36 = dma.hbm_to_vmem [thread:$0]  %s29_s14, 2048, %s31_s16, [#allocation7], %s1279_s20, %s1279_s20, %s1280_s21  }
   0x6   :  { %s17_s23 = sshll.u32 %s1281_s22, 4  ;;  %s1282_s1 = smov 64   ;;  %s18_s23 = int_to_ptr.vmem [resolvable:$true] %s17_s23 }
   0x7   :  { %s1283_s24 = smov 4   ;;  %s41_s27 = sshll.u32 %s1646_s2, 4  ;;  %s42_s27 = int_to_ptr.hbm [resolvable:$true] %s41_s27 }
   0x8   :  { %23 = dma.hbm_to_vmem [thread:$0]  %s16_s19, 1024, %s18_s23, [#allocation4], %s1282_s1, %s1282_s1, %s1283_s24  }
   0x9   :  { %s1284_s28 = smov [#allocation8]  }
   0xa   :  { %s43_s0 = sshll.u32 %s1284_s28, 4  ;;  %s44_s0 = int_to_ptr.vmem [resolvable:$true] %s43_s0 }
   0xb   :  { %49 = dma.hbm_to_vmem [thread:$0]  %s42_s27, 1024, %s44_s0, [#allocation7], %s1282_s1, %s1282_s1, %s1283_s24  }
   0xc   :  { %1272 = dma.done.wait [#allocation4], 1024  }
   0xd   :  { %1273 = vsyncadd [#allocation4], 4294966272 }
   0xe   :  { %1274 = dma.done.wait [#allocation7], 3072  }
   0xf   :  { %1275 = vsyncadd [#allocation7], 4294964224  ;;  %v994_v0 = vld [vmem:[#allocation6 + $0x70] sm:$0xf]  ;;  %v1071_v1 = vld [vmem:[#allocation6 + $0x74] sm:$0xf0] }
  0x10   :  { %v986_v2 = vld [vmem:[#allocation6 + $0x60] sm:$0xf]  ;;  %v995_v3 = vor.u32 %v1071_v1, %v994_v0  ;;  %v1069_v4 = vld [vmem:[#allocation6 + $0x64] sm:$0xf0]  ;;  %v978_v6 = vld [vmem:[#allocation6 + $0x50] sm:$0xf] }
  0x11   :  { %v987_v5 = vor.u32 %v1069_v4, %v986_v2  ;;  %v1067_v7 = vld [vmem:[#allocation6 + $0x54] sm:$0xf0]  ;;  %v1070_v8 = vld [vmem:[#allocation6 + $0x74] sm:$0xf]  ;;  %v996_v9 = vld [vmem:[#allocation6 + $0x78] sm:$0xf0] }
  0x12   :  { %222 = vmatpush.bf16.msra.mxu0 %v995_v3  ;;  %1080 = vmatpush.bf16.msra.mxu3 %v995_v3  ;;  %v999_v10 = vor.u32 %v1070_v8, %v996_v9  ;;  %v1068_v11 = vld [vmem:[#allocation6 + $0x64] sm:$0xf]  ;;  %v988_v12 = vld [vmem:[#allocation6 + $0x68] sm:$0xf0]  ;;  %v979_v13 = vor.u32 %v1067_v7, %v978_v6  ;;  %v970_v14 = vld [vmem:[#allocation6 + $0x40] sm:$0xf] }
  0x13   :  { %v1065_v15 = vld [vmem:[#allocation6 + $0x44] sm:$0xf0]  ;;  %v991_v16 = vor.u32 %v1068_v11, %v988_v12  ;;  %v1066_v17 = vld [vmem:[#allocation6 + $0x54] sm:$0xf]  ;;  %v980_v18 = vld [vmem:[#allocation6 + $0x58] sm:$0xf0] }
  0x14   :  { %271 = vmatpush.bf16.msra.mxu1 %v999_v10  ;;  %v971_v19 = vor.u32 %v1065_v15, %v970_v14  ;;  %v962_v20 = vld [vmem:[#allocation6 + $0x30] sm:$0xf]  ;;  %v1063_v21 = vld [vmem:[#allocation6 + $0x34] sm:$0xf0]  ;;  %v983_v22 = vor.u32 %v1066_v17, %v980_v18  ;;  %v1064_v23 = vld [vmem:[#allocation6 + $0x44] sm:$0xf] }
  0x15   :  { %v972_v24 = vld [vmem:[#allocation6 + $0x48] sm:$0xf0]  ;;  %v963_v25 = vor.u32 %v1063_v21, %v962_v20  ;;  %v954_v26 = vld [vmem:[#allocation6 + $0x20] sm:$0xf]  ;;  %v1061_v27 = vld [vmem:[#allocation6 + $0x24] sm:$0xf0] }
  0x16   :  { %223 = vmatpush.bf16.msra.mxu0 %v987_v5  ;;  %1081 = vmatpush.bf16.msra.mxu3 %v987_v5  ;;  %v975_v28 = vor.u32 %v1064_v23, %v972_v24  ;;  %v1062_v29 = vld [vmem:[#allocation6 + $0x34] sm:$0xf]  ;;  %v964_v30 = vld [vmem:[#allocation6 + $0x38] sm:$0xf0]  ;;  %v955_v31 = vor.u32 %v1061_v27, %v954_v26  ;;  %v946_v32 = vld [vmem:[#allocation6 + $0x10] sm:$0xf] }
  0x17   :  { %v1059_v33 = vld [vmem:[#allocation6 + $0x14] sm:$0xf0]  ;;  %v967_v34 = vor.u32 %v1062_v29, %v964_v30  ;;  %v1060_v35 = vld [vmem:[#allocation6 + $0x24] sm:$0xf]  ;;  %v956_v36 = vld [vmem:[#allocation6 + $0x28] sm:$0xf0] }
  0x18   :  { %272 = vmatpush.bf16.msra.mxu1 %v991_v16  ;;  %v947_v37 = vor.u32 %v1059_v33, %v946_v32  ;;  %v938_v38 = vld [vmem:[#allocation6] sm:$0xf]  ;;  %v1057_v39 = vld [vmem:[#allocation6 + $0x4] sm:$0xf0]  ;;  %v959_v40 = vor.u32 %v1060_v35, %v956_v36  ;;  %v1058_v41 = vld [vmem:[#allocation6 + $0x14] sm:$0xf] }
  0x19   :  { %v948_v42 = vld [vmem:[#allocation6 + $0x18] sm:$0xf0]  ;;  %v939_v43 = vor.u32 %v1057_v39, %v938_v38  ;;  %v1056_v45 = vld [vmem:[#allocation6 + $0x4] sm:$0xf]  ;;  %v940_v46 = vld [vmem:[#allocation6 + $0x8] sm:$0xf0] }
  0x1a   :  { %224 = vmatpush.bf16.msra.mxu0 %v979_v13  ;;  %1082 = vmatpush.bf16.msra.mxu3 %v979_v13  ;;  %v951_v44 = vor.u32 %v1058_v41, %v948_v42  ;;  %v1048_v47 = vld [vmem:[#allocation3] sm:$0xff]  ;;  %v1054_v48 = vld [vmem:[#allocation3 + $0x30] sm:$0xff]  ;;  %v943_v49 = vor.u32 %v1056_v45, %v940_v46  ;;  %v1049_v50 = vld [vmem:[#allocation3 + $0x8] sm:$0xff]  ;;  %s1285_s2 = smov [#allocation9]   ;;  %s890_s5 = sshll.u32 %s1647_s3, 4  ;;  %s891_s5 = int_to_ptr.hbm [resolvable:$true] %s890_s5 }
  0x1b   :  { %v1055_v51 = vld [vmem:[#allocation3 + $0x38] sm:$0xff]  ;;  %v1050_v52 = vld [vmem:[#allocation3 + $0x10] sm:$0xff]  ;;  %v1052_v54 = vld [vmem:[#allocation3 + $0x20] sm:$0xff]  ;;  %s888_s29 = sshll.u32 %s1285_s2, 4  ;;  %s889_s29 = int_to_ptr.vmem [resolvable:$true] %s888_s29 }
  0x1c   :  { %273 = vmatpush.bf16.msra.mxu1 %v983_v22  ;;  %v1051_v53 = vld [vmem:[#allocation3 + $0x18] sm:$0xff]  ;;  %v1053_v55 = vld [vmem:[#allocation3 + $0x28] sm:$0xff]  ;;  %v1078_v57 = vld [vmem:[#allocation8 + $0x30] sm:$0xff] }
  0x1d   :  { %v1079_v56 = vld [vmem:[#allocation8 + $0x38] sm:$0xff]  ;;  %v1077_v58 = vld [vmem:[#allocation8 + $0x28] sm:$0xff]  ;;  %v1076_v59 = vld [vmem:[#allocation8 + $0x20] sm:$0xff] }
  0x1e   :  { %225 = vmatpush.bf16.msra.mxu0 %v971_v19  ;;  %1083 = vmatpush.bf16.msra.mxu3 %v971_v19  ;;  %v1075_v60 = vld [vmem:[#allocation8 + $0x18] sm:$0xff]  ;;  %v1074_v63 = vld [vmem:[#allocation8 + $0x10] sm:$0xff]  ;;  %v1073_v1 = vld [vmem:[#allocation8 + $0x8] sm:$0xff] }
  0x1f   :  { %728 = vmatpush.bf16.msra.mxu2 %v1079_v56  ;;  %v1072_v7 = vld [vmem:[#allocation8] sm:$0xff] }
  0x20   :  { %274 = vmatpush.bf16.msra.mxu1 %v975_v28 }
  0x22   :  { %226 = vmatpush.bf16.msra.mxu0 %v963_v25  ;;  %1084 = vmatpush.bf16.msra.mxu3 %v963_v25 }
  0x23   :  { %729 = vmatpush.bf16.msra.mxu2 %v1078_v57 }
  0x24   :  { %275 = vmatpush.bf16.msra.mxu1 %v967_v34 }
  0x26   :  { %227 = vmatpush.bf16.msra.mxu0 %v955_v31  ;;  %1085 = vmatpush.bf16.msra.mxu3 %v955_v31 }
  0x27   :  { %730 = vmatpush.bf16.msra.mxu2 %v1077_v58 }
  0x28   :  { %276 = vmatpush.bf16.msra.mxu1 %v959_v40 }
  0x2a   :  { %228 = vmatpush.bf16.msra.mxu0 %v947_v37  ;;  %1086 = vmatpush.bf16.msra.mxu3 %v947_v37 }
  0x2b   :  { %731 = vmatpush.bf16.msra.mxu2 %v1076_v59 }
  0x2c   :  { %277 = vmatpush.bf16.msra.mxu1 %v951_v44 }
  0x2e   :  { %229 = vmatpush.bf16.msra.mxu0 %v939_v43  ;;  %1087 = vmatpush.bf16.msra.mxu3 %v939_v43 }
  0x2f   :  { %732 = vmatpush.bf16.msra.mxu2 %v1075_v60 }
  0x30   :  { %278 = vmatpush.bf16.msra.mxu1 %v943_v49 }
  0x31   :  { %230 = vmatmul.bf16.vlgmr.msra.gmra.mxu0 %v1048_v47  ;;  %260 = vmatmul.bf16.vlgmr.msra.gmra.mxu3 %v1054_v48 }
  0x32   :  { %1088 = vmatpush.bf16.msrb.mxu3 %v999_v10 }
  0x33   :  { %279 = vmatmul.bf16.vlgmr.msra.gmra.mxu1 %v1048_v47  ;;  %733 = vmatpush.bf16.msra.mxu2 %v1074_v63 }
  0x36   :  { %1089 = vmatpush.bf16.msrb.mxu3 %v991_v16 }
  0x37   :  { %734 = vmatpush.bf16.msra.mxu2 %v1073_v1 }
  0x3a   :  { %1090 = vmatpush.bf16.msrb.mxu3 %v983_v22 }
  0x3b   :  { %735 = vmatpush.bf16.msra.mxu2 %v1072_v7 }
  0x3e   :  { %1091 = vmatpush.bf16.msrb.mxu3 %v975_v28 }
  0x41   :  { %235 = vmatmul.bf16.gmra.mxu0 %v1049_v50  ;;  %265 = vmatmul.bf16.gmra.mxu3 %v1055_v51 }
  0x42   :  { %1092 = vmatpush.bf16.msrb.mxu3 %v967_v34 }
  0x43   :  { %284 = vmatmul.bf16.gmra.mxu1 %v1049_v50 }
  0x46   :  { %1093 = vmatpush.bf16.msrb.mxu3 %v959_v40 }
  0x4a   :  { %1094 = vmatpush.bf16.msrb.mxu3 %v951_v44 }
  0x4e   :  { %1095 = vmatpush.bf16.msrb.mxu3 %v943_v49 }
  0x51   :  { %240 = vmatmul.bf16.gmra.mxu0 %v1050_v52  ;;  %309 = vmatmul.bf16.vlgmr.msrb.gmra.mxu3 %v1054_v48 }
  0x52   :  { %1096 = vmatpush.bf16.msra.mxu3 %v1079_v56 }
  0x53   :  { %289 = vmatmul.bf16.gmra.mxu1 %v1050_v52 }
  0x56   :  { %1097 = vmatpush.bf16.msra.mxu3 %v1078_v57 }
  0x5a   :  { %1098 = vmatpush.bf16.msra.mxu3 %v1077_v58 }
  0x5e   :  { %1099 = vmatpush.bf16.msra.mxu3 %v1076_v59 }
  0x61   :  { %245 = vmatmul.bf16.gmra.mxu0 %v1051_v53  ;;  %314 = vmatmul.bf16.gmra.mxu3 %v1055_v51 }
  0x62   :  { %1100 = vmatpush.bf16.msra.mxu3 %v1075_v60 }
  0x63   :  { %294 = vmatmul.bf16.gmra.mxu1 %v1051_v53 }
  0x66   :  { %1101 = vmatpush.bf16.msra.mxu3 %v1074_v63 }
  0x6a   :  { %1102 = vmatpush.bf16.msra.mxu3 %v1073_v1 }
  0x6e   :  { %1103 = vmatpush.bf16.msra.mxu3 %v1072_v7 }
  0x71   :  { %250 = vmatmul.bf16.gmra.mxu0 %v1052_v54 }
  0x73   :  { %299 = vmatmul.bf16.gmra.mxu1 %v1052_v54 }
  0x81   :  { %255 = vmatmul.bf16.gmra.mxu0 %v1053_v55 }
  0x83   :  { %304 = vmatmul.bf16.gmra.mxu1 %v1053_v55 }
  0xae   :  { %v1318_v61 = vpop.f32.mrf.mxu0 }
  0xaf   :  { %v1000_v62 = vmul.f32 -1.442695, %v1318_v61 }
  0xb0   :  { %v1327_v8 = vpop.f32.mrf.mxu1 }
  0xb1   :  { %1112 = vpow2.f32 %v1000_v62 }
  0xb4   :  { %v1321_v0 = vpop.f32.mrf.mxu3 }
  0xb5   :  { %v1012_v2 = vmul.f32 -1.442695, %v1321_v0 }
  0xb6   :  { %v1324_v3 = vpop.f32.mrf.mxu0 }
  0xb7   :  { %v1113_v4 = vpop.eup %1112  ;;  %v1001_v5 = vmul.f32 -1.442695, %v1324_v3  ;;  %1114 = vpow2.f32 %v1012_v2 }
  0xb8   :  { %v368_v6 = vadd.f32 1.0, %v1113_v4  ;;  %v1341_v20 = vpop.f32.mrf.mxu1 }
  0xb9   :  { %1116 = vpow2.f32 %v1001_v5 }
  0xba   :  { %1118 = vrcp.f32 %v368_v6  ;;  %v393_v24 = vand.u32 2147483647, %v368_v6  ;;  %v395_v31 = vand.u32 2147483648, %v368_v6  ;;  %vm389_vm0 = vweird.f32 %v368_v6 }
  0xbc   :  { %v1329_v9 = vpop.f32.mrf.mxu3  ;;  %vm1358_vm1 = vcmp.eq.f32.partialorder %v393_v24, 8.507059e+37  ;;  %v396_v40 = vor.u32 1.1754944e-38, %v395_v31 }
  0xbd   :  { %v1115_v10 = vpop.eup %1114  ;;  %v1013_v11 = vmul.f32 -1.442695, %v1329_v9 }
  0xbe   :  { %v1332_v12 = vpop.f32.mrf.mxu0  ;;  %v1334_v13 = vadd.f32 1.0, %v1115_v10 }
  0xbf   :  { %v1117_v14 = vpop.eup %1116  ;;  %v1002_v15 = vmul.f32 -1.442695, %v1332_v12  ;;  %1120 = vpow2.f32 %v1013_v11 }
  0xc0   :  { %v1337_v16 = vpop.eup %1118  ;;  %v369_v17 = vadd.f32 1.0, %v1117_v14  ;;  %1122 = vrcp.f32 %v1334_v13  ;;  %v573_v42 = vand.u32 2147483647, %v1334_v13  ;;  %vm569_vm4 = vweird.f32 %v1334_v13  ;;  %v1380_v50 = vpop.f32.mrf.mxu1 }
  0xc1   :  { %v385_v18 = vmul.f32 %v1337_v16, %v368_v6  ;;  %1124 = vpow2.f32 %v1002_v15  ;;  %vm390_vm2 = vweird.f32 %v1337_v16  ;;  %v575_v48 = vand.u32 2147483648, %v1334_v13 }
  0xc2   :  { %1126 = vrcp.f32 %v369_v17  ;;  %v408_v41 = vand.u32 2147483647, %v369_v17  ;;  %v410_v45 = vand.u32 2147483648, %v369_v17  ;;  %vm1373_vm5 = vmor %vm389_vm0, %vm390_vm2  ;;  %vm404_vm6 = vweird.f32 %v369_v17 }
  0xc3   :  { %v386_v19 = vsub.f32 1.0, %v385_v18  ;;  %vm1400_vm9 = vcmp.eq.f32.partialorder %v573_v42, 8.507059e+37 }
  0xc4   :  { %v1343_v21 = vpop.f32.mrf.mxu3  ;;  %vm1396_vm8 = vcmp.eq.f32.partialorder %v408_v41, 8.507059e+37  ;;  %v411_v63 = vor.u32 1.1754944e-38, %v410_v45 }
  0xc5   :  { %v1121_v22 = vpop.eup %1120  ;;  %v387_v28 = vmul.f32 %v1337_v16, %v386_v19  ;;  %v1014_v36 = vmul.f32 -1.442695, %v1343_v21 }
  0xc6   :  { %v1345_v23 = vpop.eup %1122  ;;  %v1347_v25 = vpop.f32.mrf.mxu0  ;;  %v1349_v26 = vadd.f32 1.0, %v1121_v22 }
  0xc7   :  { %v1125_v27 = vpop.eup %1124  ;;  %v565_v29 = vmul.f32 %v1345_v23, %v1334_v13  ;;  %v1003_v33 = vmul.f32 -1.442695, %v1347_v25  ;;  %v388_v37 = vadd.f32 %v1337_v16, %v387_v28  ;;  %vm570_vm10 = vweird.f32 %v1345_v23 }
  0xc8   :  { %v1127_v30 = vpop.eup %1126  ;;  %v1354_v32 = vadd.f32 1.0, %v1125_v27  ;;  %1128 = vrcp.f32 %v1349_v26  ;;  %vm584_vm11 = vweird.f32 %v1349_v26  ;;  %vm1421_vm13 = vmor %vm569_vm4, %vm570_vm10  ;;  %v590_v18 = vand.u32 2147483648, %v1349_v26 }
  0xc9   :  { %v400_v34 = vmul.f32 %v1127_v30, %v369_v17  ;;  %v566_v39 = vsub.f32 1.0, %v565_v29  ;;  %vm405_vm3 = vweird.f32 %v1127_v30  ;;  %v392_v52 = vsel %vm1373_vm5, %v1337_v16, %v388_v37 }
  0xca   :  { %1130 = vrcp.f32 %v1354_v32  ;;  %vm1392_vm7 = vmor %vm404_vm6, %vm405_vm3  ;;  %v397_v4 = vsel %vm1358_vm1, %v396_v40, %v392_v52  ;;  %v576_v16 = vor.u32 1.1754944e-38, %v575_v48  ;;  %vm419_vm14 = vweird.f32 %v1354_v32 }
  0xcb   :  { %v401_v38 = vsub.f32 1.0, %v400_v34  ;;  %1132 = vpow2.f32 %v1003_v33  ;;  %v567_v54 = vmul.f32 %v1345_v23, %v566_v39  ;;  %v588_v24 = vand.u32 2147483647, %v1349_v26  ;;  %v1457_v39 = vpop.f32.mrf.mxu1 }
  0xcc   :  { %v1367_v43 = vpop.f32.mrf.mxu3  ;;  %1134 = vpow2.f32 %v1014_v36  ;;  %v624_v27 = vmul.f32 %v397_v4, %v1318_v61  ;;  %v423_v28 = vand.u32 2147483647, %v1354_v32  ;;  %v425_v61 = vand.u32 2147483648, %v1354_v32 }
  0xcd   :  { %v402_v44 = vmul.f32 %v1127_v30, %v401_v38  ;;  %v1015_v51 = vmul.f32 -1.442695, %v1367_v43  ;;  %v568_v7 = vadd.f32 %v1345_v23, %v567_v54  ;;  %v591_v38 = vor.u32 1.1754944e-38, %v590_v18 }
  0xce   :  { %v1370_v46 = vpop.eup %1128  ;;  %v1378_v49 = vpop.f32.mrf.mxu0  ;;  %vm589_vm1 = vcmp.eq.f32.partialorder %v588_v24, 8.507059e+37  ;;  %vm1476_vm3 = vcmp.eq.f32.partialorder %v423_v28, 8.507059e+37  ;;  %v426_v52 = vor.u32 1.1754944e-38, %v425_v61  ;;  %v640_v57 = vmul.f32 %v624_v27, %v1327_v8 }
  0xcf   :  { %v403_v53 = vadd.f32 %v1127_v30, %v402_v44  ;;  %v580_v55 = vmul.f32 %v1370_v46, %v1349_v26  ;;  %v1004_v60 = vmul.f32 -1.442695, %v1378_v49  ;;  %1136 = vpow2.f32 %v1015_v51 }
  0xd0   :  { %v1389_v56 = vpop.eup %1130  ;;  %vm585_vm12 = vweird.f32 %v1370_v46  ;;  %v572_v35 = vsel %vm1421_vm13, %v1345_v23, %v568_v7 }
  0xd1   :  { %v407_v62 = vsel %vm1392_vm7, %v1127_v30, %v403_v53  ;;  %v415_v1 = vmul.f32 %v1389_v56, %v1354_v32  ;;  %v1133_v2 = vpop.eup %1132  ;;  %v581_v5 = vsub.f32 1.0, %v580_v55  ;;  %1138 = vpow2.f32 %v1004_v60  ;;  %vm1440_vm15 = vmor %vm584_vm11, %vm585_vm12 }
  0xd2   :  { %v1414_v10 = vadd.f32 1.0, %v1133_v2  ;;  %v1135_v11 = vpop.eup %1134  ;;  %v412_v14 = vsel %vm1396_vm8, %v411_v63, %v407_v62  ;;  %vm420_vm0 = vweird.f32 %v1389_v56  ;;  %v577_v41 = vsel %vm1400_vm9, %v576_v16, %v572_v35 }
  0xd3   :  { %v416_v6 = vsub.f32 1.0, %v415_v1  ;;  %v582_v17 = vmul.f32 %v1370_v46, %v581_v5  ;;  %v1444_v31 = vadd.f32 1.0, %v1135_v11  ;;  %v625_v34 = vmul.f32 %v412_v14, %v1324_v3  ;;  %vm1472_vm2 = vmor %vm419_vm14, %vm420_vm0 }
  0xd4   :  { %v1427_v19 = vpop.f32.mrf.mxu3  ;;  %1140 = vrcp.f32 %v1414_v10  ;;  %v438_v42 = vand.u32 2147483647, %v1414_v10  ;;  %v440_v44 = vand.u32 2147483648, %v1414_v10  ;;  %v636_v55 = vmul.f32 %v577_v41, %v1321_v0 }
  0xd5   :  { %v417_v22 = vmul.f32 %v1389_v56, %v416_v6  ;;  %v1137_v13 = vpop.eup %1136  ;;  %v583_v29 = vadd.f32 %v1370_v46, %v582_v17  ;;  %1142 = vrcp.f32 %v1444_v31  ;;  %v641_v48 = vmul.f32 %v625_v34, %v1341_v20  ;;  %v1515_v17 = vpop.f32.mrf.mxu1 }
  0xd6   :  { %v1446_v33 = vpop.f32.mrf.mxu0  ;;  %v1464_v23 = vadd.f32 1.0, %v1137_v13  ;;  %vm434_vm4 = vweird.f32 %v1414_v10  ;;  %vm1492_vm5 = vcmp.eq.f32.partialorder %v438_v42, 8.507059e+37  ;;  %vm599_vm6 = vweird.f32 %v1444_v31 }
  0xd7   :  { %v1005_v36 = vmul.f32 -1.442695, %v1446_v33  ;;  %v1139_v37 = vpop.eup %1138  ;;  %v418_v26 = vadd.f32 %v1389_v56, %v417_v22  ;;  %v587_v3 = vsel %vm1440_vm15, %v1370_v46, %v583_v29  ;;  %v656_v63 = vpack.c.bf16 %v641_v48, %v640_v57 }
  0xd8   :  { %v1462_v40 = vadd.f32 1.0, %v1139_v37  ;;  %v592_v32 = vsel %vm589_vm1, %v591_v38, %v587_v3  ;;  %v605_v4 = vand.u32 2147483648, %v1444_v31  ;;  %v603_v11 = vand.u32 2147483647, %v1444_v31 }
  0xd9   :  { %1144 = vpow2.f32 %v1005_v36  ;;  %v422_v51 = vsel %vm1472_vm2, %v1389_v56, %v418_v26  ;;  %v441_v56 = vor.u32 1.1754944e-38, %v440_v44  ;;  %v637_v8 = vmul.f32 %v592_v32, %v1329_v9  ;;  %736 = vmatmul.bf16.vlgmr.msra.gmra.mxu2 %v656_v63 }
  0xda   :  { %v1141_v45 = vpop.eup %1140  ;;  %1146 = vrcp.f32 %v1462_v40  ;;  %v427_v0 = vsel %vm1476_vm3, %v426_v52, %v422_v51  ;;  %v652_v24 = vmul.f32 %v636_v55, %v1427_v19  ;;  %v606_v28 = vor.u32 1.1754944e-38, %v605_v4 }
  0xdb   :  { %v430_v53 = vmul.f32 %v1141_v45, %v1414_v10  ;;  %1148 = vrcp.f32 %v1464_v23  ;;  %v1490_v20 = vpop.eup %1142  ;;  %vm435_vm7 = vweird.f32 %v1141_v45  ;;  %v626_v9 = vmul.f32 %v427_v0, %v1332_v12 }
  0xdc   :  { %v312_v54 = vpop.f32.mrf.mxu3  ;;  %v595_v62 = vmul.f32 %v1490_v20, %v1444_v31  ;;  %vm600_vm8 = vweird.f32 %v1490_v20  ;;  %vm436_vm9 = vmor %vm434_vm4, %vm435_vm7  ;;  %v620_v29 = vand.u32 2147483648, %v1464_v23  ;;  %vm614_vm11 = vweird.f32 %v1464_v23 }
  0xdd   :  { %v431_v58 = vsub.f32 1.0, %v430_v53  ;;  %v653_v13 = vmul.f32 %v637_v8, %v312_v54  ;;  %vm1527_vm10 = vmor %vm599_vm6, %vm600_vm8  ;;  %v618_v36 = vand.u32 2147483647, %v1464_v23  ;;  %vm604_vm13 = vcmp.eq.f32.partialorder %v603_v11, 8.507059e+37  ;;  %v292_v57 = vpop.f32.mrf.mxu1 }
  0xde   :  { %v1497_v60 = vpop.f32.mrf.mxu0  ;;  %v596_v7 = vsub.f32 1.0, %v595_v62  ;;  %v621_v44 = vor.u32 1.1754944e-38, %v620_v29  ;;  %v455_v32 = vand.u32 2147483648, %v1462_v40  ;;  %v642_v54 = vmul.f32 %v626_v9, %v1380_v50 }
  0xdf   :  { %v1145_v1 = vpop.eup %1144  ;;  %v432_v2 = vmul.f32 %v1141_v45, %v431_v58  ;;  %v1006_v5 = vmul.f32 -1.442695, %v1497_v60  ;;  %v662_v3 = vpack.c.bf16 %v653_v13, %v652_v24  ;;  %vm619_vm15 = vcmp.eq.f32.partialorder %v618_v36, 8.507059e+37 }
  0xe0   :  { %v1506_v6 = vpop.eup %1146  ;;  %v1510_v14 = vadd.f32 1.0, %v1145_v1  ;;  %v597_v22 = vmul.f32 %v1490_v20, %v596_v7  ;;  %vm449_vm2 = vweird.f32 %v1462_v40  ;;  %v456_v4 = vor.u32 1.1754944e-38, %v455_v32 }
  0xe1   :  { %v433_v15 = vadd.f32 %v1141_v45, %v432_v2  ;;  %v445_v16 = vmul.f32 %v1506_v6, %v1462_v40  ;;  %1150 = vpow2.f32 %v1006_v5  ;;  %v1149_v18 = vpop.eup %1148  ;;  %766 = vmatmul.bf16.vlgmr.msra.gmra.mxu3 %v662_v3  ;;  %vm450_vm0 = vweird.f32 %v1506_v6 }
  0xe2   :  { %1152 = vrcp.f32 %v1510_v14  ;;  %v610_v10 = vmul.f32 %v1149_v18, %v1464_v23  ;;  %v598_v61 = vadd.f32 %v1490_v20, %v597_v22  ;;  %vm615_vm12 = vweird.f32 %v1149_v18  ;;  %vm1574_vm3 = vmor %vm449_vm2, %vm450_vm0 }
  0xe3   :  { %v437_v12 = vsel %vm436_vm9, %v1141_v45, %v433_v15  ;;  %v446_v19 = vsub.f32 1.0, %v445_v16  ;;  %vm1548_vm14 = vmor %vm614_vm11, %vm615_vm12  ;;  %v468_v50 = vand.u32 2147483647, %v1510_v14  ;;  %v453_v2 = vand.u32 2147483647, %v1462_v40 }
  0xe4   :  { %v315_v30 = vpop.f32.mrf.mxu3  ;;  %v442_v34 = vsel %vm1492_vm5, %v441_v56, %v437_v12  ;;  %v611_v35 = vsub.f32 1.0, %v610_v10  ;;  %v602_v26 = vsel %vm1527_vm10, %v1490_v20, %v598_v61  ;;  %vm464_vm4 = vweird.f32 %v1510_v14 }
  0xe5   :  { %v627_v31 = vmul.f32 %v442_v34, %v1347_v25  ;;  %v447_v25 = vmul.f32 %v1506_v6, %v446_v19  ;;  %v607_v51 = vsel %vm604_vm13, %v606_v28, %v602_v26  ;;  %vm469_vm6 = vcmp.eq.f32.partialorder %v468_v50, 8.507059e+37 }
  0xe6   :  { %v1539_v37 = vpop.f32.mrf.mxu0  ;;  %v612_v42 = vmul.f32 %v1149_v18, %v611_v35  ;;  %v638_v58 = vmul.f32 %v607_v51, %v1343_v21  ;;  %vm454_vm7 = vcmp.eq.f32.partialorder %v453_v2, 8.507059e+37 }
  0xe7   :  { %v1007_v38 = vmul.f32 -1.442695, %v1539_v37  ;;  %v1151_v41 = vpop.eup %1150  ;;  %v643_v46 = vmul.f32 %v627_v31, %v1457_v39  ;;  %v470_v39 = vand.u32 2147483648, %v1510_v14  ;;  %v448_v20 = vadd.f32 %v1506_v6, %v447_v25 }
  0xe8   :  { %v1153_v45 = vpop.eup %1152  ;;  %v1553_v48 = vadd.f32 1.0, %v1151_v41  ;;  %v613_v53 = vadd.f32 %v1149_v18, %v612_v42  ;;  %v654_v15 = vmul.f32 %v638_v58, %v315_v30 }
  0xe9   :  { %1154 = vpow2.f32 %v1007_v38  ;;  %v460_v52 = vmul.f32 %v1153_v45, %v1510_v14  ;;  %v657_v56 = vpack.c.bf16 %v643_v46, %v642_v54  ;;  %vm465_vm1 = vweird.f32 %v1153_v45 }
  0xea   :  { %1156 = vrcp.f32 %v1553_v48  ;;  %v617_v55 = vsel %vm1548_vm14, %v1149_v18, %v613_v53  ;;  %v452_v40 = vsel %vm1574_vm3, %v1506_v6, %v448_v20  ;;  %vm466_vm5 = vmor %vm464_vm4, %vm465_vm1  ;;  %v295_v6 = vpop.f32.mrf.mxu1  ;;  %vm479_vm10 = vweird.f32 %v1553_v48 }
  0xeb   :  { %v461_v23 = vsub.f32 1.0, %v460_v52  ;;  %v622_v59 = vsel %vm619_vm15, %v621_v44, %v617_v55  ;;  %741 = vmatmul.bf16.gmra.mxu2 %v657_v56  ;;  %v457_v24 = vsel %vm454_vm7, %v456_v4, %v452_v40  ;;  %v485_v42 = vand.u32 2147483648, %v1553_v48 }
  0xec   :  { %v639_v8 = vmul.f32 %v622_v59, %v1367_v43  ;;  %v317_v63 = vpop.f32.mrf.mxu3  ;;  %v471_v43 = vor.u32 1.1754944e-38, %v470_v39  ;;  %v628_v29 = vmul.f32 %v457_v24, %v1378_v49 }
  0xed   :  { %v462_v0 = vmul.f32 %v1153_v45, %v461_v23 }
  0xee   :  { %v1567_v62 = vpop.f32.mrf.mxu0  ;;  %v655_v16 = vmul.f32 %v639_v8, %v317_v63 }
  0xef   :  { %v1155_v1 = vpop.eup %1154  ;;  %v1008_v5 = vmul.f32 -1.442695, %v1567_v62  ;;  %v463_v7 = vadd.f32 %v1153_v45, %v462_v0 }
  0xf0   :  { %v375_v11 = vadd.f32 1.0, %v1155_v1  ;;  %v1579_v9 = vpop.eup %1156  ;;  %v663_v27 = vpack.c.bf16 %v655_v16, %v654_v15 }
  0xf1   :  { %1158 = vpow2.f32 %v1008_v5  ;;  %v467_v18 = vsel %vm466_vm5, %v1153_v45, %v463_v7  ;;  %v475_v22 = vmul.f32 %v1579_v9, %v1553_v48  ;;  %vm480_vm8 = vweird.f32 %v1579_v9 }
  0xf2   :  { %1160 = vrcp.f32 %v375_v11  ;;  %v472_v14 = vsel %vm469_vm6, %v471_v43, %v467_v18  ;;  %771 = vmatmul.bf16.gmra.mxu3 %v663_v27  ;;  %v498_v26 = vand.u32 2147483647, %v375_v11  ;;  %v500_v49 = vand.u32 2147483648, %v375_v11  ;;  %vm1603_vm11 = vmor %vm479_vm10, %vm480_vm8  ;;  %v297_v32 = vpop.f32.mrf.mxu1 }
  0xf3   :  { %v629_v13 = vmul.f32 %v472_v14, %v1446_v33  ;;  %v476_v12 = vsub.f32 1.0, %v475_v22  ;;  %v644_v33 = vmul.f32 %v628_v29, %v1515_v17  ;;  %v483_v17 = vand.u32 2147483647, %v1553_v48 }
  0xf4   :  { %vm494_vm12 = vweird.f32 %v375_v11  ;;  %vm499_vm14 = vcmp.eq.f32.partialorder %v498_v26, 8.507059e+37  ;;  %v501_v52 = vor.u32 1.1754944e-38, %v500_v49  ;;  %v486_v48 = vor.u32 1.1754944e-38, %v485_v42 }
  0xf5   :  { %v477_v61 = vmul.f32 %v1579_v9, %v476_v12  ;;  %v645_v35 = vmul.f32 %v629_v13, %v292_v57  ;;  %vm484_vm15 = vcmp.eq.f32.partialorder %v483_v17, 8.507059e+37 }
  0xf6   :  { %v1588_v28 = vpop.f32.mrf.mxu0 }
  0xf7   :  { %v1159_v10 = vpop.eup %1158  ;;  %v1009_v30 = vmul.f32 -1.442695, %v1588_v28  ;;  %v478_v38 = vadd.f32 %v1579_v9, %v477_v61  ;;  %v658_v41 = vpack.c.bf16 %v645_v35, %v644_v33 }
  0xf8   :  { %v1161_v34 = vpop.eup %1160  ;;  %v1592_v19 = vadd.f32 1.0, %v1159_v10 }
  0xf9   :  { %v490_v31 = vmul.f32 %v1161_v34, %v375_v11  ;;  %1162 = vpow2.f32 %v1009_v30  ;;  %vm495_vm9 = vweird.f32 %v1161_v34  ;;  %v482_v54 = vsel %vm1603_vm11, %v1579_v9, %v478_v38 }
  0xfa   :  { %1164 = vrcp.f32 %v1592_v19  ;;  %vm496_vm13 = vmor %vm494_vm12, %vm495_vm9  ;;  %v487_v57 = vsel %vm484_vm15, %v486_v48, %v482_v54  ;;  %v300_v5 = vpop.f32.mrf.mxu1  ;;  %vm509_vm2 = vweird.f32 %v1592_v19  ;;  %v515_v40 = vand.u32 2147483648, %v1592_v19 }
  0xfb   :  { %v491_v36 = vsub.f32 1.0, %v490_v31  ;;  %746 = vmatmul.bf16.gmra.mxu2 %v658_v41  ;;  %v630_v0 = vmul.f32 %v487_v57, %v1497_v60  ;;  %v513_v18 = vand.u32 2147483647, %v1592_v19 }
  0xfc   :  { %v516_v10 = vor.u32 1.1754944e-38, %v515_v40 }
  0xfd   :  { %v492_v3 = vmul.f32 %v1161_v34, %v491_v36  ;;  %v646_v21 = vmul.f32 %v630_v0, %v295_v6  ;;  %vm514_vm7 = vcmp.eq.f32.partialorder %v513_v18, 8.507059e+37 }
  0xfe   :  { %v1601_v44 = vpop.f32.mrf.mxu0 }
  0xff   :  { %v1163_v45 = vpop.eup %1162  ;;  %v493_v47 = vadd.f32 %v1161_v34, %v492_v3  ;;  %v1010_v46 = vmul.f32 -1.442695, %v1601_v44 }
 0x100   :  { %v1165_v51 = vpop.eup %1164  ;;  %v377_v53 = vadd.f32 1.0, %v1163_v45 }
 0x101   :  { %v497_v23 = vsel %vm496_vm13, %v1161_v34, %v493_v47  ;;  %v505_v39 = vmul.f32 %v1165_v51, %v1592_v19  ;;  %1166 = vpow2.f32 %v1010_v46  ;;  %vm510_vm0 = vweird.f32 %v1165_v51 }
 0x102   :  { %v502_v55 = vsel %vm499_vm14, %v501_v52, %v497_v23  ;;  %1168 = vrcp.f32 %v377_v53  ;;  %v528_v7 = vand.u32 2147483647, %v377_v53  ;;  %v530_v43 = vand.u32 2147483648, %v377_v53  ;;  %vm1623_vm3 = vmor %vm509_vm2, %vm510_vm0  ;;  %v302_v34 = vpop.f32.mrf.mxu1 }
 0x103   :  { %v631_v20 = vmul.f32 %v502_v55, %v1539_v37  ;;  %v506_v58 = vsub.f32 1.0, %v505_v39  ;;  %vm524_vm4 = vweird.f32 %v377_v53 }
 0x104   :  { %v531_v24 = vor.u32 1.1754944e-38, %v530_v43  ;;  %vm529_vm6 = vcmp.eq.f32.partialorder %v528_v7, 8.507059e+37 }
 0x105   :  { %v507_v1 = vmul.f32 %v1165_v51, %v506_v58  ;;  %v647_v4 = vmul.f32 %v631_v20, %v297_v32 }
 0x106   :  { %v1614_v59 = vpop.f32.mrf.mxu0 }
 0x107   :  { %v1167_v56 = vpop.eup %1166  ;;  %v1011_v50 = vmul.f32 -1.442695, %v1614_v59  ;;  %v508_v11 = vadd.f32 %v1165_v51, %v507_v1  ;;  %v659_v60 = vpack.c.bf16 %v647_v4, %v646_v21 }
 0x108   :  { %v1169_v8 = vpop.eup %1168  ;;  %v1618_v63 = vadd.f32 1.0, %v1167_v56 }
 0x109   :  { %v520_v2 = vmul.f32 %v1169_v8, %v377_v53  ;;  %1170 = vpow2.f32 %v1011_v50  ;;  %vm525_vm1 = vweird.f32 %v1169_v8  ;;  %v512_v12 = vsel %vm1623_vm3, %v1165_v51, %v508_v11 }
 0x10a   :  { %1172 = vrcp.f32 %v1618_v63  ;;  %vm526_vm5 = vmor %vm524_vm4, %vm525_vm1  ;;  %v517_v30 = vsel %vm514_vm7, %v516_v10, %v512_v12  ;;  %vm539_vm10 = vweird.f32 %v1618_v63  ;;  %v305_v17 = vpop.f32.mrf.mxu1 }
 0x10b   :  { %v521_v37 = vsub.f32 1.0, %v520_v2  ;;  %751 = vmatmul.bf16.gmra.mxu2 %v659_v60  ;;  %v632_v31 = vmul.f32 %v517_v30, %v1567_v62  ;;  %v543_v62 = vand.u32 2147483647, %v1618_v63 }
 0x10d   :  { %v522_v9 = vmul.f32 %v1169_v8, %v521_v37  ;;  %v648_v49 = vmul.f32 %v632_v31, %v300_v5  ;;  %vm544_vm15 = vcmp.eq.f32.partialorder %v543_v62, 8.507059e+37 }
 0x10f   :  { %v1171_v15 = vpop.eup %1170  ;;  %v523_v22 = vadd.f32 %v1169_v8, %v522_v9 }
 0x110   :  { %v1173_v14 = vpop.eup %1172  ;;  %v379_v13 = vadd.f32 1.0, %v1171_v15 }
 0x111   :  { %v527_v27 = vsel %vm526_vm5, %v1169_v8, %v523_v22  ;;  %v535_v6 = vmul.f32 %v1173_v14, %v1618_v63  ;;  %vm540_vm8 = vweird.f32 %v1173_v14 }
 0x112   :  { %v532_v29 = vsel %vm529_vm6, %v531_v24, %v527_v27  ;;  %1174 = vrcp.f32 %v379_v13  ;;  %v558_v3 = vand.u32 2147483647, %v379_v13  ;;  %v560_v41 = vand.u32 2147483648, %v379_v13  ;;  %vm541_vm11 = vmor %vm539_vm10, %vm540_vm8  ;;  %v307_v48 = vpop.f32.mrf.mxu1 }
 0x113   :  { %v633_v19 = vmul.f32 %v532_v29, %v1588_v28  ;;  %v536_v61 = vsub.f32 1.0, %v535_v6  ;;  %v545_v28 = vand.u32 2147483648, %v1618_v63  ;;  %vm554_vm12 = vweird.f32 %v379_v13 }
 0x114   :  { %v561_v46 = vor.u32 1.1754944e-38, %v560_v41  ;;  %vm559_vm14 = vcmp.eq.f32.partialorder %v558_v3, 8.507059e+37 }
 0x115   :  { %v537_v33 = vmul.f32 %v1173_v14, %v536_v61  ;;  %v649_v26 = vmul.f32 %v633_v19, %v302_v34  ;;  %v546_v53 = vor.u32 1.1754944e-38, %v545_v28 }
 0x117   :  { %v538_v42 = vadd.f32 %v1173_v14, %v537_v33  ;;  %v660_v25 = vpack.c.bf16 %v649_v26, %v648_v49 }
 0x118   :  { %v1175_v35 = vpop.eup %1174 }
 0x119   :  { %v550_v36 = vmul.f32 %v1175_v35, %v379_v13  ;;  %vm555_vm9 = vweird.f32 %v1175_v35  ;;  %v542_v51 = vsel %vm541_vm11, %v1173_v14, %v538_v42 }
 0x11a   :  { %vm556_vm13 = vmor %vm554_vm12, %vm555_vm9  ;;  %v547_v54 = vsel %vm544_vm15, %v546_v53, %v542_v51 }
 0x11b   :  { %v551_v38 = vsub.f32 1.0, %v550_v36  ;;  %756 = vmatmul.bf16.gmra.mxu2 %v660_v25  ;;  %v634_v39 = vmul.f32 %v547_v54, %v1601_v44 }
 0x11d   :  { %v552_v45 = vmul.f32 %v1175_v35, %v551_v38  ;;  %v650_v57 = vmul.f32 %v634_v39, %v305_v17 }
 0x11f   :  { %v553_v47 = vadd.f32 %v1175_v35, %v552_v45 }
 0x121   :  { %v557_v52 = vsel %vm556_vm13, %v1175_v35, %v553_v47 }
 0x122   :  { %v562_v32 = vsel %vm559_vm14, %v561_v46, %v557_v52 }
 0x123   :  { %v635_v23 = vmul.f32 %v562_v32, %v1614_v59 }
 0x125   :  { %v651_v55 = vmul.f32 %v635_v23, %v307_v48 }
 0x127   :  { %v661_v20 = vpack.c.bf16 %v651_v55, %v650_v57 }
 0x12b   :  { %761 = vmatmul.bf16.gmra.mxu2 %v661_v20 }
 0x15c   :  { %v737_v58 = vpop.f32.mrf.mxu2 }
 0x15d   :  { %868 = vst [vmem:[#allocation9] sm:$0xff] %v737_v58 }
 0x164   :  { %v739_v56 = vpop.f32.mrf.mxu2  ;;  %v767_v0 = vpop.f32.mrf.mxu3 }
 0x165   :  { %869 = vst [vmem:[#allocation9 + $0x8] sm:$0xff] %v739_v56 }
 0x166   :  { %880 = vst [vmem:[#allocation9 + $0x60] sm:$0xff] %v767_v0 }
 0x16c   :  { %v769_v8 = vpop.f32.mrf.mxu3 }
 0x16d   :  { %881 = vst [vmem:[#allocation9 + $0x68] sm:$0xff] %v769_v8 }
 0x16e   :  { %v742_v50 = vpop.f32.mrf.mxu2 }
 0x16f   :  { %870 = vst [vmem:[#allocation9 + $0x10] sm:$0xff] %v742_v50 }
 0x175   :  { %v772_v1 = vpop.f32.mrf.mxu3 }
 0x176   :  { %v744_v63 = vpop.f32.mrf.mxu2  ;;  %882 = vst [vmem:[#allocation9 + $0x70] sm:$0xff] %v772_v1 }
 0x177   :  { %871 = vst [vmem:[#allocation9 + $0x18] sm:$0xff] %v744_v63 }
 0x17d   :  { %v774_v59 = vpop.f32.mrf.mxu3 }
 0x17e   :  { %v747_v44 = vpop.f32.mrf.mxu2  ;;  %883 = vst [vmem:[#allocation9 + $0x78] sm:$0xff] %v774_v59 }
 0x17f   :  { %872 = vst [vmem:[#allocation9 + $0x20] sm:$0xff] %v747_v44 }
 0x186   :  { %v749_v2 = vpop.f32.mrf.mxu2 }
 0x187   :  { %873 = vst [vmem:[#allocation9 + $0x28] sm:$0xff] %v749_v2 }
 0x18e   :  { %v752_v4 = vpop.f32.mrf.mxu2 }
 0x18f   :  { %874 = vst [vmem:[#allocation9 + $0x30] sm:$0xff] %v752_v4 }
 0x196   :  { %v754_v5 = vpop.f32.mrf.mxu2 }
 0x197   :  { %875 = vst [vmem:[#allocation9 + $0x38] sm:$0xff] %v754_v5 }
 0x19e   :  { %v757_v21 = vpop.f32.mrf.mxu2 }
 0x19f   :  { %876 = vst [vmem:[#allocation9 + $0x40] sm:$0xff] %v757_v21 }
 0x1a6   :  { %v759_v37 = vpop.f32.mrf.mxu2 }
 0x1a7   :  { %877 = vst [vmem:[#allocation9 + $0x48] sm:$0xff] %v759_v37 }
 0x1ae   :  { %v762_v7 = vpop.f32.mrf.mxu2 }
 0x1af   :  { %878 = vst [vmem:[#allocation9 + $0x50] sm:$0xff] %v762_v7 }
 0x1b6   :  { %v764_v43 = vpop.f32.mrf.mxu2 }
 0x1b7   :  { %879 = vst [vmem:[#allocation9 + $0x58] sm:$0xff] %v764_v43 }
 0x1b8   :  { %896 = dma.vmem_to_hbm [thread:$0]  %s889_s29, 2048, %s891_s5, [#allocation5], %s1279_s20, %s1279_s20, %s1280_s21  }
 0x1b9   :  { %1276 = dma.done.wait [#allocation5], 2048  }
 0x1ba   :  { %1277 = vsyncadd [#allocation5], 4294965248 }
 0x1bb   :  { %901 = vsyncpa [#allocation4], 1 }
 0x1bc   :  { %902 = vsyncpa [#allocation7], 1 }
 0x1bd   :  { %903 = vsyncpa [#allocation5], 1 }

</bundles_post_ra>
